<compile_context>
chip_gen: v7x
topology: tpu7x:2x2x1
jax: 0.10.0
libtpu: 0.0.40
codegen_flags: <defaults>
</compile_context>

<pallas_src>
import functools

import jax
import jax.numpy as jnp
from jax.experimental import pallas as pl
from jax.experimental.pallas import tpu as pltpu


def _round_up(a, b):
    return ((a + b - 1) // b) * b


def _mlp_layer_kernel(x_ref, ln_w_ref, wgu_ref, wd_ref, o_ref, *, eps, inter):
    # x_ref: (TM, H) tile of the flattened hidden states (residual source).
    x = x_ref[...]

    # --- Mamba2RMSNorm (fp32 internally, like the torch code) ----------------
    xf = x.astype(jnp.float32)
    var = jnp.mean(xf * xf, axis=-1, keepdims=True)
    normed = xf * jax.lax.rsqrt(var + eps)
    normed = ln_w_ref[...] * normed.astype(x.dtype)        # (1,H) * (TM,H)

    # --- HelixmRNAMLP: down( silu(gate(h)) * up(h) ) -------------------------
    # gate and up are fused into one (H, 2I) matmul; split the f32 result.
    gu = jnp.dot(normed, wgu_ref[...], preferred_element_type=jnp.float32)  # (TM, 2I)
    g = gu[:, :inter]
    u = gu[:, inter:]
    act = g * jax.nn.sigmoid(g)                            # SiLU in f32 (EUP/VPU)
    h = (act * u).astype(x.dtype)                          # cast only at matmul boundary
    y = jnp.dot(h, wd_ref[...], preferred_element_type=jnp.float32)         # (TM, H)

    # --- residual add (f32) ---------------------------------------------------
    o_ref[...] = (xf + y).astype(o_ref.dtype)


def _build_call(M_pad, H, I, tm, dtype, eps, single_buffer_weights):
    kernel = functools.partial(_mlp_layer_kernel, eps=eps, inter=I)

    # Constant-index weights: request single-buffering to halve their VMEM.
    wkw = {"pipeline_mode": pl.Buffered(1)} if single_buffer_weights else {}
    in_specs = [
        pl.BlockSpec((tm, H), lambda i: (i, 0)),            # x row tile
        pl.BlockSpec((1, H), lambda i: (0, 0), **wkw),      # rmsnorm scale
        pl.BlockSpec((H, 2 * I), lambda i: (0, 0), **wkw),  # fused [gate|up] (H, 2I)
        pl.BlockSpec((I, H), lambda i: (0, 0), **wkw),      # down proj (I, H)
    ]

    dsize = jnp.dtype(dtype).itemsize
    flops = 6 * M_pad * H * I + 4 * M_pad * I               # two fused matmuls + eltwise
    bytes_accessed = (2 * M_pad * H + 3 * H * I + H) * dsize
    cost = pl.CostEstimate(flops=int(flops),
                           transcendentals=int(M_pad * I + M_pad),
                           bytes_accessed=int(bytes_accessed))

    # VMEM budget: weights (+double buffer if fallback) + pipelined IO tiles
    # + f32 intermediates; clamp to stay inside v7x's 64 MiB physical VMEM.
    weight_bufs = 1 if single_buffer_weights else 2
    vmem_needed = (weight_bufs * (3 * H * I + H) * dsize
                   + 2 * 2 * tm * H * dsize
                   + tm * (3 * I + 2 * H) * 4
                   + (1 << 20))
    vmem_limit = int(min(max(vmem_needed, 32 << 20), 56 << 20))

    return pl.pallas_call(
        kernel,
        out_shape=jax.ShapeDtypeStruct((M_pad, H), dtype),
        grid_spec=pltpu.PrefetchScalarGridSpec(
            num_scalar_prefetch=0,
            grid=(M_pad // tm,),
            in_specs=in_specs,
            out_specs=pl.BlockSpec((tm, H), lambda i: (i, 0)),
        ),
        compiler_params=pltpu.CompilerParams(
            dimension_semantics=("parallel",),
            vmem_limit_bytes=vmem_limit),
        cost_estimate=cost,
    )


def helix_mrna_mlp_layer(hidden_states, ln_weight, w_gate, w_up, w_down,
                         *, eps=1e-6, tile_m=256):
    """hidden_states: (B, S, H).  Weights (already transposed vs torch Linear.weight):
         ln_weight (H,), w_gate (H, I), w_up (H, I), w_down (I, H), with I = 4*H."""
    B, S, H = hidden_states.shape
    I = w_gate.shape[1]
    M = B * S

    # Effective row tile: as large as requested, but never bigger than the
    # (8-row aligned) problem size, so small problems don't over-pad.
    tm = max(8, _round_up(min(tile_m, _round_up(M, 8)), 8))
    M_pad = _round_up(M, tm)

    x2d = hidden_states.reshape(M, H)
    if M_pad != M:
        # Zero rows normalize to zero and produce zero MLP output -> harmless.
        x2d = jnp.pad(x2d, ((0, M_pad - M), (0, 0)))
    ln2d = ln_weight.reshape(1, H).astype(hidden_states.dtype)
    w_gu = jnp.concatenate([w_gate, w_up], axis=1)          # fused (H, 2I)

    # TODO(synk): for configs where 3*H*I weight bytes exceed ~48 MiB (not the case
    # for Helix-mRNA sizes), add an "arbitrary" grid axis over the intermediate dim
    # with a VMEM f32 accumulator for the down-projection.

    try:
        call = _build_call(M_pad, H, I, tm, hidden_states.dtype, eps,
                           single_buffer_weights=True)
        out = jax.block_until_ready(call(x2d, ln2d, w_gu, w_down))
    except Exception:
        # Fallback for JAX versions where pl.Buffered(1) is rejected: default
        # double-buffered weights (correctness identical).
        call = _build_call(M_pad, H, I, tm, hidden_states.dtype, eps,
                           single_buffer_weights=False)
        out = call(x2d, ln2d, w_gu, w_down)

    if M_pad != M:
        out = out[:M]
    return out.reshape(B, S, H)


def _reference(hidden_states, ln_weight, w_gate, w_up, w_down, eps=1e-6):
    x = hidden_states
    xf = x.astype(jnp.float32)
    var = jnp.mean(xf * xf, axis=-1, keepdims=True)
    normed = ln_weight * (xf * jax.lax.rsqrt(var + eps)).astype(x.dtype)
    g = normed @ w_gate
    u = normed @ w_up
    y = (jax.nn.silu(g) * u) @ w_down
    return x + y


if __name__ == "__main__":
    # Small shapes consistent with the module: hidden_size=32 -> intermediate=128.
    B, S, H = 2, 8, 32
    I = 4 * H
    eps = 1e-6

    key = jax.random.PRNGKey(0)
    kx, kg, ku, kd, kx2 = jax.random.split(key, 5)

    hidden_states = jax.random.normal(kx, (B, S, H), dtype=jnp.float32)

    # Deterministic synthetic parameters (torch layout: Linear.weight is (out,in);
    # we build them as (in,out) directly, i.e. already transposed).
    ln_weight = jnp.ones((H,), dtype=jnp.float32)
    w_gate = jax.random.normal(kg, (H, I), dtype=jnp.float32) * 0.05
    w_up = jax.random.normal(ku, (H, I), dtype=jnp.float32) * 0.05
    w_down = jax.random.normal(kd, (I, H), dtype=jnp.float32) * 0.05

    out = helix_mrna_mlp_layer(hidden_states, ln_weight, w_gate, w_up, w_down, eps=eps)
    out = jax.block_until_ready(out)

    ref = _reference(hidden_states, ln_weight, w_gate, w_up, w_down, eps=eps)
    assert out.shape == (B, S, H)
    assert jnp.allclose(out, ref, atol=1e-4, rtol=1e-4), "mismatch vs reference"

    # Second check: ragged row count (exercises zero-padding + multi-step grid).
    B2, S2 = 3, 37
    hs2 = jax.random.normal(kx2, (B2, S2, H), dtype=jnp.float32)
    out2 = helix_mrna_mlp_layer(hs2, ln_weight, w_gate, w_up, w_down,
                                eps=eps, tile_m=16)
    out2 = jax.block_until_ready(out2)
    ref2 = _reference(hs2, ln_weight, w_gate, w_up, w_down, eps=eps)
    assert out2.shape == (B2, S2, H)
    assert jnp.allclose(out2, ref2, atol=1e-4, rtol=1e-4), "mismatch vs reference (ragged)"

    print("KERNEL_OK")
</pallas_src>

<mosaic_0001>
module attributes {stable_mosaic.version = 11 : i64} {
  func.func @_mlp_layer_kernel(%arg0: i32, %arg1: memref<16x32xf32, #tpu.memory_space<vmem>>, %arg2: memref<1x32xf32, #tpu.memory_space<vmem>>, %arg3: memref<32x256xf32, #tpu.memory_space<vmem>>, %arg4: memref<128x32xf32, #tpu.memory_space<vmem>>, %arg5: memref<16x32xf32, #tpu.memory_space<vmem>>) attributes {dimension_semantics = [#tpu.dimension_semantics<parallel>], iteration_bounds = array<i64: 1>, scalar_prefetch = 0 : i64, scratch_operands = 0 : i64, tpu.core_type = #tpu.core_type<tc>, window_params = [{transform_indices = @transform_0, window_bounds = array<i64: 16, 32>}, {pipeline_mode = #tpu.pipeline_mode<synchronous>, transform_indices = @transform_1, window_bounds = array<i64: 1, 32>}, {pipeline_mode = #tpu.pipeline_mode<synchronous>, transform_indices = @transform_2, window_bounds = array<i64: 32, 256>}, {pipeline_mode = #tpu.pipeline_mode<synchronous>, transform_indices = @transform_3, window_bounds = array<i64: 128, 32>}, {transform_indices = @transform_4, window_bounds = array<i64: 16, 32>}]} {
    %c0 = arith.constant 0 : index
    %c0_0 = arith.constant 0 : index
    %0 = vector.load %arg1[%c0, %c0_0] : memref<16x32xf32, #tpu.memory_space<vmem>>, vector<16x32xf32>
    %1 = arith.mulf %0, %0 : vector<16x32xf32>
    %cst = arith.constant dense<0.000000e+00> : vector<16xf32>
    %2 = vector.multi_reduction <add>, %1, %cst [1] : vector<16x32xf32> to vector<16xf32>
    %3 = vector.shape_cast %2 : vector<16xf32> to vector<16x1xf32>
    %cst_1 = arith.constant 3.200000e+01 : f32
    %4 = vector.broadcast %cst_1 : f32 to vector<16x1xf32>
    %5 = arith.divf %3, %4 : vector<16x1xf32>
    %cst_2 = arith.constant 9.99999997E-7 : f32
    %6 = vector.broadcast %cst_2 : f32 to vector<16x1xf32>
    %7 = arith.addf %5, %6 : vector<16x1xf32>
    %8 = math.rsqrt %7 : vector<16x1xf32>
    %9 = vector.broadcast %8 : vector<16x1xf32> to vector<16x32xf32>
    %10 = arith.mulf %0, %9 : vector<16x32xf32>
    %c0_3 = arith.constant 0 : index
    %c0_4 = arith.constant 0 : index
    %11 = vector.load %arg2[%c0_3, %c0_4] : memref<1x32xf32, #tpu.memory_space<vmem>>, vector<1x32xf32>
    %12 = vector.broadcast %11 : vector<1x32xf32> to vector<16x32xf32>
    %13 = arith.mulf %12, %10 : vector<16x32xf32>
    %c0_5 = arith.constant 0 : index
    %c0_6 = arith.constant 0 : index
    %14 = vector.load %arg3[%c0_5, %c0_6] : memref<32x256xf32, #tpu.memory_space<vmem>>, vector<32x256xf32>
    %cst_7 = arith.constant dense<0.000000e+00> : vector<16x256xf32>
    %15 = tpu.matmul %13, %14, %cst_7 {dimension_numbers = #tpu.dot_dimension_numbers<[1], [0], [0], [1], [0, 0, 1, 1], [], []>} : vector<16x32xf32>, vector<32x256xf32>, vector<16x256xf32> -> vector<16x256xf32>
    %16 = vector.extract_strided_slice %15 {offsets = [0, 0], sizes = [16, 128], strides = [1, 1]} : vector<16x256xf32> to vector<16x128xf32>
    %17 = vector.extract_strided_slice %15 {offsets = [0, 128], sizes = [16, 128], strides = [1, 1]} : vector<16x256xf32> to vector<16x128xf32>
    %18 = arith.negf %16 : vector<16x128xf32>
    %19 = math.exp %18 : vector<16x128xf32>
    %cst_8 = arith.constant 1.000000e+00 : f32
    %20 = vector.broadcast %cst_8 : f32 to vector<16x128xf32>
    %21 = arith.addf %20, %19 : vector<16x128xf32>
    %22 = arith.divf %20, %21 : vector<16x128xf32>
    %23 = arith.mulf %16, %22 : vector<16x128xf32>
    %24 = arith.mulf %23, %17 : vector<16x128xf32>
    %c0_9 = arith.constant 0 : index
    %c0_10 = arith.constant 0 : index
    %25 = vector.load %arg4[%c0_9, %c0_10] : memref<128x32xf32, #tpu.memory_space<vmem>>, vector<128x32xf32>
    %cst_11 = arith.constant dense<0.000000e+00> : vector<16x32xf32>
    %26 = tpu.matmul %24, %25, %cst_11 {dimension_numbers = #tpu.dot_dimension_numbers<[1], [0], [0], [1], [0, 0, 1, 1], [], []>} : vector<16x128xf32>, vector<128x32xf32>, vector<16x32xf32> -> vector<16x32xf32>
    %27 = arith.addf %0, %26 : vector<16x32xf32>
    %c0_12 = arith.constant 0 : index
    %c0_13 = arith.constant 0 : index
    %28 = vector.load %arg5[%c0_12, %c0_13] : memref<16x32xf32, #tpu.memory_space<vmem>>, vector<16x32xf32>
    tpu.vector_store %arg5[%c0_12, %c0_13], %27 {strides = array<i32>} : memref<16x32xf32, #tpu.memory_space<vmem>>, vector<16x32xf32>,
    return
  }
  func.func @transform_0(%arg0: i32) -> (i32, i32) {
    %c0_i32 = arith.constant 0 : i32
    %c0_i32_0 = arith.constant 0 : i32
    return %arg0, %c0_i32 : i32, i32
  }
  func.func @transform_1(%arg0: i32) -> (i32, i32) {
    %c0_i32 = arith.constant 0 : i32
    %c0_i32_0 = arith.constant 0 : i32
    %c0_i32_1 = arith.constant 0 : i32
    return %c0_i32, %c0_i32_0 : i32, i32
  }
  func.func @transform_2(%arg0: i32) -> (i32, i32) {
    %c0_i32 = arith.constant 0 : i32
    %c0_i32_0 = arith.constant 0 : i32
    %c0_i32_1 = arith.constant 0 : i32
    return %c0_i32, %c0_i32_0 : i32, i32
  }
  func.func @transform_3(%arg0: i32) -> (i32, i32) {
    %c0_i32 = arith.constant 0 : i32
    %c0_i32_0 = arith.constant 0 : i32
    %c0_i32_1 = arith.constant 0 : i32
    return %c0_i32, %c0_i32_0 : i32, i32
  }
  func.func @transform_4(%arg0: i32) -> (i32, i32) {
    %c0_i32 = arith.constant 0 : i32
    %c0_i32_0 = arith.constant 0 : i32
    return %arg0, %c0_i32 : i32, i32
  }
}

module attributes {stable_mosaic.version = 11 : i64} {
  func.func @_mlp_layer_kernel(%arg0: i32, %arg1: memref<16x32xf32, #tpu.memory_space<vmem>>, %arg2: memref<1x32xf32, #tpu.memory_space<vmem>>, %arg3: memref<32x256xf32, #tpu.memory_space<vmem>>, %arg4: memref<128x32xf32, #tpu.memory_space<vmem>>, %arg5: memref<16x32xf32, #tpu.memory_space<vmem>>) attributes {dimension_semantics = [#tpu.dimension_semantics<parallel>], iteration_bounds = array<i64: 1>, scalar_prefetch = 0 : i64, scratch_operands = 0 : i64, tpu.core_type = #tpu.core_type<tc>, window_params = [{transform_indices = @transform_0, window_bounds = array<i64: 16, 32>}, {pipeline_mode = #tpu.pipeline_mode<synchronous>, transform_indices = @transform_1, window_bounds = array<i64: 1, 32>}, {pipeline_mode = #tpu.pipeline_mode<synchronous>, transform_indices = @transform_2, window_bounds = array<i64: 32, 256>}, {pipeline_mode = #tpu.pipeline_mode<synchronous>, transform_indices = @transform_3, window_bounds = array<i64: 128, 32>}, {transform_indices = @transform_4, window_bounds = array<i64: 16, 32>}]} {
    %c0 = arith.constant 0 : index
    %c0_0 = arith.constant 0 : index
    %0 = vector.load %arg1[%c0, %c0_0] : memref<16x32xf32, #tpu.memory_space<vmem>>, vector<16x32xf32>
    %1 = arith.mulf %0, %0 : vector<16x32xf32>
    %cst = arith.constant dense<0.000000e+00> : vector<16xf32>
    %2 = vector.multi_reduction <add>, %1, %cst [1] : vector<16x32xf32> to vector<16xf32>
    %3 = vector.shape_cast %2 : vector<16xf32> to vector<16x1xf32>
    %cst_1 = arith.constant 3.200000e+01 : f32
    %4 = vector.broadcast %cst_1 : f32 to vector<16x1xf32>
    %5 = arith.divf %3, %4 : vector<16x1xf32>
    %cst_2 = arith.constant 9.99999997E-7 : f32
    %6 = vector.broadcast %cst_2 : f32 to vector<16x1xf32>
    %7 = arith.addf %5, %6 : vector<16x1xf32>
    %8 = math.rsqrt %7 : vector<16x1xf32>
    %9 = vector.broadcast %8 : vector<16x1xf32> to vector<16x32xf32>
    %10 = arith.mulf %0, %9 : vector<16x32xf32>
    %c0_3 = arith.constant 0 : index
    %c0_4 = arith.constant 0 : index
    %11 = vector.load %arg2[%c0_3, %c0_4] : memref<1x32xf32, #tpu.memory_space<vmem>>, vector<1x32xf32>
    %12 = vector.broadcast %11 : vector<1x32xf32> to vector<16x32xf32>
    %13 = arith.mulf %12, %10 : vector<16x32xf32>
    %c0_5 = arith.constant 0 : index
    %c0_6 = arith.constant 0 : index
    %14 = vector.load %arg3[%c0_5, %c0_6] : memref<32x256xf32, #tpu.memory_space<vmem>>, vector<32x256xf32>
    %cst_7 = arith.constant dense<0.000000e+00> : vector<16x256xf32>
    %15 = tpu.matmul %13, %14, %cst_7 {dimension_numbers = #tpu.dot_dimension_numbers<[1], [0], [0], [1], [0, 0, 1, 1], [], []>} : vector<16x32xf32>, vector<32x256xf32>, vector<16x256xf32> -> vector<16x256xf32>
    %16 = vector.extract_strided_slice %15 {offsets = [0, 0], sizes = [16, 128], strides = [1, 1]} : vector<16x256xf32> to vector<16x128xf32>
    %17 = vector.extract_strided_slice %15 {offsets = [0, 128], sizes = [16, 128], strides = [1, 1]} : vector<16x256xf32> to vector<16x128xf32>
    %18 = arith.negf %16 : vector<16x128xf32>
    %19 = math.exp %18 : vector<16x128xf32>
    %cst_8 = arith.constant 1.000000e+00 : f32
    %20 = vector.broadcast %cst_8 : f32 to vector<16x128xf32>
    %21 = arith.addf %20, %19 : vector<16x128xf32>
    %22 = arith.divf %20, %21 : vector<16x128xf32>
    %23 = arith.mulf %16, %22 : vector<16x128xf32>
    %24 = arith.mulf %23, %17 : vector<16x128xf32>
    %c0_9 = arith.constant 0 : index
    %c0_10 = arith.constant 0 : index
    %25 = vector.load %arg4[%c0_9, %c0_10] : memref<128x32xf32, #tpu.memory_space<vmem>>, vector<128x32xf32>
    %cst_11 = arith.constant dense<0.000000e+00> : vector<16x32xf32>
    %26 = tpu.matmul %24, %25, %cst_11 {dimension_numbers = #tpu.dot_dimension_numbers<[1], [0], [0], [1], [0, 0, 1, 1], [], []>} : vector<16x128xf32>, vector<128x32xf32>, vector<16x32xf32> -> vector<16x32xf32>
    %27 = arith.addf %0, %26 : vector<16x32xf32>
    %c0_12 = arith.constant 0 : index
    %c0_13 = arith.constant 0 : index
    %28 = vector.load %arg5[%c0_12, %c0_13] : memref<16x32xf32, #tpu.memory_space<vmem>>, vector<16x32xf32>
    tpu.vector_store %arg5[%c0_12, %c0_13], %27 {strides = array<i32>} : memref<16x32xf32, #tpu.memory_space<vmem>>, vector<16x32xf32>,
    return
  }
  func.func @transform_0(%arg0: i32) -> (i32, i32) {
    %c0_i32 = arith.constant 0 : i32
    %c0_i32_0 = arith.constant 0 : i32
    return %arg0, %c0_i32 : i32, i32
  }
  func.func @transform_1(%arg0: i32) -> (i32, i32) {
    %c0_i32 = arith.constant 0 : i32
    %c0_i32_0 = arith.constant 0 : i32
    %c0_i32_1 = arith.constant 0 : i32
    return %c0_i32, %c0_i32_0 : i32, i32
  }
  func.func @transform_2(%arg0: i32) -> (i32, i32) {
    %c0_i32 = arith.constant 0 : i32
    %c0_i32_0 = arith.constant 0 : i32
    %c0_i32_1 = arith.constant 0 : i32
    return %c0_i32, %c0_i32_0 : i32, i32
  }
  func.func @transform_3(%arg0: i32) -> (i32, i32) {
    %c0_i32 = arith.constant 0 : i32
    %c0_i32_0 = arith.constant 0 : i32
    %c0_i32_1 = arith.constant 0 : i32
    return %c0_i32, %c0_i32_0 : i32, i32
  }
  func.func @transform_4(%arg0: i32) -> (i32, i32) {
    %c0_i32 = arith.constant 0 : i32
    %c0_i32_0 = arith.constant 0 : i32
    return %arg0, %c0_i32 : i32, i32
  }
}

</mosaic_0001>

<bundles_post_ra>
// kernel: tpu_custom_call.1
= control target key start
LH: loop header
LB: loop body
LE: loop exit
PB: predicated region body
PF: predicated region fallthrough
CT: control target
= control target key end

     0   :  { %vm22_vm0 = vcmask 261120   ;;  %s543_s0 = inlined_call_operand.vmem [shape: f32[16,32], index: 0, kind: input, shape index: {}]   ;;  %s544_s1 = inlined_call_operand.vmem [shape: f32[1,32], index: 1, kind: input, shape index: {}]   ;;  %s545_s2 = inlined_call_operand.vmem [shape: f32[32,256], index: 2, kind: input, shape index: {}]   ;;  %s546_s3 = inlined_call_operand.vmem [shape: f32[128,32], index: 3, kind: input, shape index: {}]   ;;  %s547_s4 = inlined_call_operand.hbm [shape: f32[16,32], index: 4, kind: output, shape index: {}]  }
   0x1   :  { %v435_v0 = vld [vmem:[%s543_s0] sm:$0xff]  ;;  %v440_v1 = vld [vmem:[%s543_s0 + $0x8] sm:$0xff] }
   0x2   :  { %9 = vsyncpa [#allocation3], 0  ;;  %v20_v2 = vmul.f32 %v435_v0, %v435_v0  ;;  %v21_v3 = vmul.f32 %v440_v1, %v440_v1  ;;  %v48_v6 = vld [vmem:[%s545_s2 + $0x8] sm:$0xff]  ;;  %v50_v7 = vld [vmem:[%s545_s2 + $0x18] sm:$0xff]  ;;  %v403_v13 = vmov 0.0  }
   0x3   :  { %v47_v8 = vld [vmem:[%s545_s2] sm:$0xff]  ;;  %v323_v9 = vpack.c.bf16 %v50_v7, %v48_v6  ;;  %v49_v10 = vld [vmem:[%s545_s2 + $0x10] sm:$0xff]  ;;  %v52_v11 = vld [vmem:[%s545_s2 + $0x28] sm:$0xff]  ;;  %125 = vmatprep.mubr.f32.mxu0 %v403_v13 }
   0x4   :  { %v23_v4 = vsel %vm22_vm0, %v20_v2, 0.0  ;;  %v26_v5 = vsel %vm22_vm0, %v21_v3, 0.0  ;;  %v54_v12 = vld [vmem:[%s545_s2 + $0x38] sm:$0xff]  ;;  %v325_v14 = vpack.c.bf16 %v49_v10, %v47_v8  ;;  %v51_v16 = vld [vmem:[%s545_s2 + $0x20] sm:$0xff]  ;;  %v53_v17 = vld [vmem:[%s545_s2 + $0x30] sm:$0xff] }
   0x5   :  { %24 = vadd.xlane.f32.xlu0 %v23_v4  ;;  %v327_v15 = vpack.c.bf16 %v54_v12, %v52_v11  ;;  %324 = vmatprep.subr.bf16.mxu0 %v323_v9  ;;  %v329_v18 = vpack.c.bf16 %v53_v17, %v51_v16  ;;  %v265_v26 = vld [vmem:[%s544_s1] ss:$0 sm:$0xff]  ;;  %v155_v33 = vld [vmem:[%s546_s3 + $0x8] sm:$0xff]  ;;  %v156_v35 = vld [vmem:[%s546_s3 + $0x10] sm:$0xff] }
   0x6   :  { %326 = vmatpush1.bf16.msra.mxu0 %v325_v14  ;;  %v154_v32 = vld [vmem:[%s546_s3] sm:$0xff]  ;;  %v157_v36 = vld [vmem:[%s546_s3 + $0x18] sm:$0xff]  ;;  %v159_v39 = vld [vmem:[%s546_s3 + $0x28] sm:$0xff] }
   0x7   :  { %328 = vmatprep.subr.bf16.mxu0 %v327_v15  ;;  %v331_v34 = vpack.c.bf16 %v155_v33, %v154_v32  ;;  %v335_v37 = vpack.c.bf16 %v157_v36, %v156_v35  ;;  %v158_v38 = vld [vmem:[%s546_s3 + $0x20] sm:$0xff]  ;;  %v160_v41 = vld [vmem:[%s546_s3 + $0x30] sm:$0xff]  ;;  %v161_v42 = vld [vmem:[%s546_s3 + $0x38] sm:$0xff] }
   0x8   :  { %v339_v40 = vpack.c.bf16 %v159_v39, %v158_v38  ;;  %v343_v43 = vpack.c.bf16 %v161_v42, %v160_v41  ;;  %v162_v44 = vld [vmem:[%s546_s3 + $0x40] sm:$0xff]  ;;  %v163_v45 = vld [vmem:[%s546_s3 + $0x48] sm:$0xff]  ;;  %v164_v47 = vld [vmem:[%s546_s3 + $0x50] sm:$0xff] }
   0x9   :  { %27 = vadd.xlane.f32.xlu0 %v26_v5  ;;  %332 = vmatprep.subr.bf16.mxu1 %v331_v34  ;;  %v347_v46 = vpack.c.bf16 %v163_v45, %v162_v44  ;;  %v165_v48 = vld [vmem:[%s546_s3 + $0x58] sm:$0xff]  ;;  %v166_v50 = vld [vmem:[%s546_s3 + $0x60] sm:$0xff]  ;;  %v167_v51 = vld [vmem:[%s546_s3 + $0x68] sm:$0xff] }
   0xa   :  { %330 = vmatpush1.bf16.msra.mxu0 %v329_v18  ;;  %334 = vmatpush3.bf16.msra.mxu1 %v331_v34  ;;  %v351_v49 = vpack.c.bf16 %v165_v48, %v164_v47  ;;  %v355_v52 = vpack.c.bf16 %v167_v51, %v166_v50  ;;  %v168_v53 = vld [vmem:[%s546_s3 + $0x70] sm:$0xff]  ;;  %v169_v54 = vld [vmem:[%s546_s3 + $0x78] sm:$0xff]  ;;  %s404_s3 = smov [#allocation2]  }
   0xb   :  { %336 = vmatprep.subr.bf16.mxu1 %v335_v37  ;;  %v359_v55 = vpack.c.bf16 %v169_v54, %v168_v53  ;;  %s254_s12 = sshll.u32 %s404_s3, 4  ;;  %s255_s12 = int_to_ptr.vmem [resolvable:$true] %s254_s12 }
   0xc   :  { %s379_s1 = scalar_lea.vmem %s255_s12, 256  ;;  %p384_p1 = scmp.lt.s32.totalorder %s255_s12, %s255_s12 }
   0xd   :  { %p380_p0 = scmp.ne.s32.totalorder %s255_s12, %s379_s1  ;;  %p385_p2 = scmp.lt.s32.totalorder %s379_s1, %s379_s1 }
   0xe   :  { %338 = vmatpush3.bf16.msra.mxu1 %v335_v37 }
   0xf   :  { %340 = vmatprep.subr.bf16.mxu1 %v339_v40  ;;  %p386_p3 = por %p385_p2, %p384_p1 }
  0x11   :  { %p387_p4 = pnand %p386_p3, %p380_p0 }
  0x12   :  { %342 = vmatpush3.bf16.msra.mxu1 %v339_v40 }
  0x13   :  { %344 = vmatprep.subr.bf16.mxu1 %v343_v43 }
  0x16   :  { %346 = vmatpush3.bf16.msra.mxu1 %v343_v43 }
  0x17   :  { %348 = vmatprep.subr.bf16.mxu1 %v347_v46 }
  0x1a   :  { %350 = vmatpush3.bf16.msra.mxu1 %v347_v46 }
  0x1b   :  { %352 = vmatprep.subr.bf16.mxu1 %v351_v49 }
  0x1e   :  { %354 = vmatpush3.bf16.msra.mxu1 %v351_v49 }
  0x1f   :  { %356 = vmatprep.subr.bf16.mxu1 %v355_v52 }
  0x22   :  { %358 = vmatpush3.bf16.msra.mxu1 %v355_v52 }
  0x23   :  { %360 = vmatprep.subr.bf16.mxu1 %v359_v55 }
  0x26   :  { %362 = vmatpush3.bf16.msra.mxu1 %v359_v55 }
  0x92   :  { %v25_v19 = vpop.xlane.xlu0 %24 }
  0x93   :  { %v30_v20 = vmul.f32 0.03125, %v25_v19 }
  0x95   :  { %v32_v21 = vadd.f32 1e-06, %v30_v20 }
  0x96   :  { %v28_v22 = vpop.xlane.xlu0 %27 }
  0x97   :  { %367 = vrsqrt.f32 %v32_v21  ;;  %v31_v23 = vmul.f32 0.03125, %v28_v22 }
  0x99   :  { %v33_v24 = vadd.f32 1e-06, %v31_v23 }
  0x9b   :  { %369 = vrsqrt.f32 %v33_v24 }
  0xa1   :  { %v368_v25 = vpop.eup %367 }
  0xa2   :  { %v36_v27 = vmul.f32 %v368_v25, %v435_v0 }
  0xa4   :  { %v45_v28 = vmul.f32 %v265_v26, %v36_v27 }
  0xa5   :  { %v370_v29 = vpop.eup %369 }
  0xa6   :  { %266 = vmatmul.mubr.msk.f32.vlgmr.msra.gmra.mrb[0].mxu0 %vm22_vm0, %v45_v28  ;;  %v37_v30 = vmul.f32 %v370_v29, %v440_v1 }
  0xa7   :  { %131 = vmatprep.mubr.f32.mxu0 %v403_v13 }
  0xa8   :  { %v46_v31 = vmul.f32 %v265_v26, %v37_v30 }
  0xaa   :  { %267 = vmatmul.mubr.msk.f32.gmra.mrb[2].mxu0 %vm22_vm0, %v46_v31 }
 0x179   :  { %v127_v56 = vpop.f32.mrb[0].mxu0 }
 0x17a   :  { %v268_v57 = vmul.f32 -1.442695, %v127_v56  ;;  %v129_v58 = vpop.f32.mrb[1].mxu0 }
 0x17c   :  { %371 = vpow2.f32 %v268_v57 }
 0x17d   :  { %v133_v59 = vpop.f32.mrb[2].mxu0 }
 0x17e   :  { %v269_v60 = vmul.f32 -1.442695, %v133_v59  ;;  %v135_v61 = vpop.f32.mrb[3].mxu0 }
 0x180   :  { %373 = vpow2.f32 %v269_v60 }
 0x186   :  { %v372_v62 = vpop.eup %371 }
 0x187   :  { %v144_v63 = vadd.f32 1.0, %v372_v62 }
 0x189   :  { %375 = vrcp.f32 %v144_v63 }
 0x18a   :  { %v374_v2 = vpop.eup %373 }
 0x18b   :  { %v145_v3 = vadd.f32 1.0, %v374_v2 }
 0x18d   :  { %377 = vrcp.f32 %v145_v3 }
 0x193   :  { %v376_v4 = vpop.eup %375 }
 0x194   :  { %v150_v5 = vmul.f32 %v376_v4, %v127_v56 }
 0x196   :  { %v152_v6 = vmul.f32 %v150_v5, %v129_v58 }
 0x197   :  { %v378_v7 = vpop.eup %377 }
 0x198   :  { %v151_v8 = vmul.f32 %v378_v7, %v133_v59  ;;  %320 = vmatprep.mubr.f32.mxu1 %v152_v6 }
 0x19a   :  { %v153_v9 = vmul.f32 %v151_v8, %v135_v61 }
 0x19c   :  { %321 = vmatmul.mubr.f32.vlgmr.msra.gmra.mrb[0].mxu1 %v153_v9 }
 0x26f   :  { %v322_v10 = vpop.f32.mrb[0].mxu1 }
 0x270   :  { %v246_v11 = vadd.f32 %v322_v10, %v440_v1  ;;  %v236_v12 = vpop.f32.mrb[1].mxu1 }
 0x271   :  { %v245_v13 = vadd.f32 %v236_v12, %v435_v0 }
 0x272   :  { %248 = vst.msk [vmem:[#allocation2 + $0x8] sm:$0xff] %vm22_vm0, %v246_v11 }
 0x273   :  { %247 = vst.msk [vmem:[#allocation2] sm:$0xff] %vm22_vm0, %v245_v13 }
 0x274   :  { %390 = shalt.err (!%p387_p4)
}
 0x275   :  { %s391_s15 = scalar_lea.hbm %s547_s4, 256 }
 0x276   :  { %p392_p5 = scmp.ne.s32.totalorder %s547_s4, %s391_s15  ;;  %p395_p6 = scmp.lt.u32.totalorder %s391_s15, %s547_s4 }
 0x278   :  { %p397_p7 = pnand %p395_p6, %p392_p5 }
 0x27a   :  { %400 = shalt.err (!%p397_p7)
}
 0x27b   :  { %s405_s20 = smov 128   ;;  %s406_s21 = smov 8  }
 0x27c   :  { %260 = dma.vmem_to_hbm [thread:$0]  %s255_s12, 256, %s547_s4, [#allocation3], %s405_s20, %s405_s20, %s406_s21  }
 0x27d   :  { %401 = dma.done.wait [#allocation3], 256  }
 0x27e   :  { %402 = vsyncadd [#allocation3], 4294967040 }
 0x27f   :  { %264 = vsyncpa [#allocation3], 1 }

// kernel: tpu_custom_call.1
= control target key start
LH: loop header
LB: loop body
LE: loop exit
PB: predicated region body
PF: predicated region fallthrough
CT: control target
= control target key end

     0   :  { %vm22_vm0 = vcmask 261120   ;;  %s543_s0 = inlined_call_operand.vmem [shape: f32[16,32], index: 0, kind: input, shape index: {}]   ;;  %s544_s1 = inlined_call_operand.vmem [shape: f32[1,32], index: 1, kind: input, shape index: {}]   ;;  %s545_s2 = inlined_call_operand.vmem [shape: f32[32,256], index: 2, kind: input, shape index: {}]   ;;  %s546_s3 = inlined_call_operand.vmem [shape: f32[128,32], index: 3, kind: input, shape index: {}]   ;;  %s547_s4 = inlined_call_operand.hbm [shape: f32[16,32], index: 4, kind: output, shape index: {}]  }
   0x1   :  { %v435_v0 = vld [vmem:[%s543_s0] sm:$0xff]  ;;  %v440_v1 = vld [vmem:[%s543_s0 + $0x8] sm:$0xff] }
   0x2   :  { %9 = vsyncpa [#allocation3], 0  ;;  %v20_v2 = vmul.f32 %v435_v0, %v435_v0  ;;  %v21_v3 = vmul.f32 %v440_v1, %v440_v1  ;;  %v48_v6 = vld [vmem:[%s545_s2 + $0x8] sm:$0xff]  ;;  %v50_v7 = vld [vmem:[%s545_s2 + $0x18] sm:$0xff]  ;;  %v403_v13 = vmov 0.0  }
   0x3   :  { %v47_v8 = vld [vmem:[%s545_s2] sm:$0xff]  ;;  %v323_v9 = vpack.c.bf16 %v50_v7, %v48_v6  ;;  %v49_v10 = vld [vmem:[%s545_s2 + $0x10] sm:$0xff]  ;;  %v52_v11 = vld [vmem:[%s545_s2 + $0x28] sm:$0xff]  ;;  %125 = vmatprep.mubr.f32.mxu0 %v403_v13 }
   0x4   :  { %v23_v4 = vsel %vm22_vm0, %v20_v2, 0.0  ;;  %v26_v5 = vsel %vm22_vm0, %v21_v3, 0.0  ;;  %v54_v12 = vld [vmem:[%s545_s2 + $0x38] sm:$0xff]  ;;  %v325_v14 = vpack.c.bf16 %v49_v10, %v47_v8  ;;  %v51_v16 = vld [vmem:[%s545_s2 + $0x20] sm:$0xff]  ;;  %v53_v17 = vld [vmem:[%s545_s2 + $0x30] sm:$0xff] }
   0x5   :  { %24 = vadd.xlane.f32.xlu0 %v23_v4  ;;  %v327_v15 = vpack.c.bf16 %v54_v12, %v52_v11  ;;  %324 = vmatprep.subr.bf16.mxu0 %v323_v9  ;;  %v329_v18 = vpack.c.bf16 %v53_v17, %v51_v16  ;;  %v265_v26 = vld [vmem:[%s544_s1] ss:$0 sm:$0xff]  ;;  %v155_v33 = vld [vmem:[%s546_s3 + $0x8] sm:$0xff]  ;;  %v156_v35 = vld [vmem:[%s546_s3 + $0x10] sm:$0xff] }
   0x6   :  { %326 = vmatpush1.bf16.msra.mxu0 %v325_v14  ;;  %v154_v32 = vld [vmem:[%s546_s3] sm:$0xff]  ;;  %v157_v36 = vld [vmem:[%s546_s3 + $0x18] sm:$0xff]  ;;  %v159_v39 = vld [vmem:[%s546_s3 + $0x28] sm:$0xff] }
   0x7   :  { %328 = vmatprep.subr.bf16.mxu0 %v327_v15  ;;  %v331_v34 = vpack.c.bf16 %v155_v33, %v154_v32  ;;  %v335_v37 = vpack.c.bf16 %v157_v36, %v156_v35  ;;  %v158_v38 = vld [vmem:[%s546_s3 + $0x20] sm:$0xff]  ;;  %v160_v41 = vld [vmem:[%s546_s3 + $0x30] sm:$0xff]  ;;  %v161_v42 = vld [vmem:[%s546_s3 + $0x38] sm:$0xff] }
   0x8   :  { %v339_v40 = vpack.c.bf16 %v159_v39, %v158_v38  ;;  %v343_v43 = vpack.c.bf16 %v161_v42, %v160_v41  ;;  %v162_v44 = vld [vmem:[%s546_s3 + $0x40] sm:$0xff]  ;;  %v163_v45 = vld [vmem:[%s546_s3 + $0x48] sm:$0xff]  ;;  %v164_v47 = vld [vmem:[%s546_s3 + $0x50] sm:$0xff] }
   0x9   :  { %27 = vadd.xlane.f32.xlu0 %v26_v5  ;;  %332 = vmatprep.subr.bf16.mxu1 %v331_v34  ;;  %v347_v46 = vpack.c.bf16 %v163_v45, %v162_v44  ;;  %v165_v48 = vld [vmem:[%s546_s3 + $0x58] sm:$0xff]  ;;  %v166_v50 = vld [vmem:[%s546_s3 + $0x60] sm:$0xff]  ;;  %v167_v51 = vld [vmem:[%s546_s3 + $0x68] sm:$0xff] }
   0xa   :  { %330 = vmatpush1.bf16.msra.mxu0 %v329_v18  ;;  %334 = vmatpush3.bf16.msra.mxu1 %v331_v34  ;;  %v351_v49 = vpack.c.bf16 %v165_v48, %v164_v47  ;;  %v355_v52 = vpack.c.bf16 %v167_v51, %v166_v50  ;;  %v168_v53 = vld [vmem:[%s546_s3 + $0x70] sm:$0xff]  ;;  %v169_v54 = vld [vmem:[%s546_s3 + $0x78] sm:$0xff]  ;;  %s404_s3 = smov [#allocation2]  }
   0xb   :  { %336 = vmatprep.subr.bf16.mxu1 %v335_v37  ;;  %v359_v55 = vpack.c.bf16 %v169_v54, %v168_v53  ;;  %s254_s12 = sshll.u32 %s404_s3, 4  ;;  %s255_s12 = int_to_ptr.vmem [resolvable:$true] %s254_s12 }
   0xc   :  { %s379_s1 = scalar_lea.vmem %s255_s12, 256  ;;  %p384_p1 = scmp.lt.s32.totalorder %s255_s12, %s255_s12 }
   0xd   :  { %p380_p0 = scmp.ne.s32.totalorder %s255_s12, %s379_s1  ;;  %p385_p2 = scmp.lt.s32.totalorder %s379_s1, %s379_s1 }
   0xe   :  { %338 = vmatpush3.bf16.msra.mxu1 %v335_v37 }
   0xf   :  { %340 = vmatprep.subr.bf16.mxu1 %v339_v40  ;;  %p386_p3 = por %p385_p2, %p384_p1 }
  0x11   :  { %p387_p4 = pnand %p386_p3, %p380_p0 }
  0x12   :  { %342 = vmatpush3.bf16.msra.mxu1 %v339_v40 }
  0x13   :  { %344 = vmatprep.subr.bf16.mxu1 %v343_v43 }
  0x16   :  { %346 = vmatpush3.bf16.msra.mxu1 %v343_v43 }
  0x17   :  { %348 = vmatprep.subr.bf16.mxu1 %v347_v46 }
  0x1a   :  { %350 = vmatpush3.bf16.msra.mxu1 %v347_v46 }
  0x1b   :  { %352 = vmatprep.subr.bf16.mxu1 %v351_v49 }
  0x1e   :  { %354 = vmatpush3.bf16.msra.mxu1 %v351_v49 }
  0x1f   :  { %356 = vmatprep.subr.bf16.mxu1 %v355_v52 }
  0x22   :  { %358 = vmatpush3.bf16.msra.mxu1 %v355_v52 }
  0x23   :  { %360 = vmatprep.subr.bf16.mxu1 %v359_v55 }
  0x26   :  { %362 = vmatpush3.bf16.msra.mxu1 %v359_v55 }
  0x92   :  { %v25_v19 = vpop.xlane.xlu0 %24 }
  0x93   :  { %v30_v20 = vmul.f32 0.03125, %v25_v19 }
  0x95   :  { %v32_v21 = vadd.f32 1e-06, %v30_v20 }
  0x96   :  { %v28_v22 = vpop.xlane.xlu0 %27 }
  0x97   :  { %367 = vrsqrt.f32 %v32_v21  ;;  %v31_v23 = vmul.f32 0.03125, %v28_v22 }
  0x99   :  { %v33_v24 = vadd.f32 1e-06, %v31_v23 }
  0x9b   :  { %369 = vrsqrt.f32 %v33_v24 }
  0xa1   :  { %v368_v25 = vpop.eup %367 }
  0xa2   :  { %v36_v27 = vmul.f32 %v368_v25, %v435_v0 }
  0xa4   :  { %v45_v28 = vmul.f32 %v265_v26, %v36_v27 }
  0xa5   :  { %v370_v29 = vpop.eup %369 }
  0xa6   :  { %266 = vmatmul.mubr.msk.f32.vlgmr.msra.gmra.mrb[0].mxu0 %vm22_vm0, %v45_v28  ;;  %v37_v30 = vmul.f32 %v370_v29, %v440_v1 }
  0xa7   :  { %131 = vmatprep.mubr.f32.mxu0 %v403_v13 }
  0xa8   :  { %v46_v31 = vmul.f32 %v265_v26, %v37_v30 }
  0xaa   :  { %267 = vmatmul.mubr.msk.f32.gmra.mrb[2].mxu0 %vm22_vm0, %v46_v31 }
 0x179   :  { %v127_v56 = vpop.f32.mrb[0].mxu0 }
 0x17a   :  { %v268_v57 = vmul.f32 -1.442695, %v127_v56  ;;  %v129_v58 = vpop.f32.mrb[1].mxu0 }
 0x17c   :  { %371 = vpow2.f32 %v268_v57 }
 0x17d   :  { %v133_v59 = vpop.f32.mrb[2].mxu0 }
 0x17e   :  { %v269_v60 = vmul.f32 -1.442695, %v133_v59  ;;  %v135_v61 = vpop.f32.mrb[3].mxu0 }
 0x180   :  { %373 = vpow2.f32 %v269_v60 }
 0x186   :  { %v372_v62 = vpop.eup %371 }
 0x187   :  { %v144_v63 = vadd.f32 1.0, %v372_v62 }
 0x189   :  { %375 = vrcp.f32 %v144_v63 }
 0x18a   :  { %v374_v2 = vpop.eup %373 }
 0x18b   :  { %v145_v3 = vadd.f32 1.0, %v374_v2 }
 0x18d   :  { %377 = vrcp.f32 %v145_v3 }
 0x193   :  { %v376_v4 = vpop.eup %375 }
 0x194   :  { %v150_v5 = vmul.f32 %v376_v4, %v127_v56 }
 0x196   :  { %v152_v6 = vmul.f32 %v150_v5, %v129_v58 }
 0x197   :  { %v378_v7 = vpop.eup %377 }
 0x198   :  { %v151_v8 = vmul.f32 %v378_v7, %v133_v59  ;;  %320 = vmatprep.mubr.f32.mxu1 %v152_v6 }
 0x19a   :  { %v153_v9 = vmul.f32 %v151_v8, %v135_v61 }
 0x19c   :  { %321 = vmatmul.mubr.f32.vlgmr.msra.gmra.mrb[0].mxu1 %v153_v9 }
 0x26f   :  { %v322_v10 = vpop.f32.mrb[0].mxu1 }
 0x270   :  { %v246_v11 = vadd.f32 %v322_v10, %v440_v1  ;;  %v236_v12 = vpop.f32.mrb[1].mxu1 }
 0x271   :  { %v245_v13 = vadd.f32 %v236_v12, %v435_v0 }
 0x272   :  { %248 = vst.msk [vmem:[#allocation2 + $0x8] sm:$0xff] %vm22_vm0, %v246_v11 }
 0x273   :  { %247 = vst.msk [vmem:[#allocation2] sm:$0xff] %vm22_vm0, %v245_v13 }
 0x274   :  { %390 = shalt.err (!%p387_p4)
}
 0x275   :  { %s391_s15 = scalar_lea.hbm %s547_s4, 256 }
 0x276   :  { %p392_p5 = scmp.ne.s32.totalorder %s547_s4, %s391_s15  ;;  %p395_p6 = scmp.lt.u32.totalorder %s391_s15, %s547_s4 }
 0x278   :  { %p397_p7 = pnand %p395_p6, %p392_p5 }
 0x27a   :  { %400 = shalt.err (!%p397_p7)
}
 0x27b   :  { %s405_s20 = smov 128   ;;  %s406_s21 = smov 8  }
 0x27c   :  { %260 = dma.vmem_to_hbm [thread:$0]  %s255_s12, 256, %s547_s4, [#allocation3], %s405_s20, %s405_s20, %s406_s21  }
 0x27d   :  { %401 = dma.done.wait [#allocation3], 256  }
 0x27e   :  { %402 = vsyncadd [#allocation3], 4294967040 }
 0x27f   :  { %264 = vsyncpa [#allocation3], 1 }

</bundles_post_ra>
